<compile_context>
chip_gen: v5e
topology: v5e:2x2
jax: 0.10.0
libtpu: 0.0.40
codegen_flags: <defaults>
</compile_context>

<pallas_src>
from functools import partial

import jax
import jax.numpy as jnp
from jax.experimental import pallas as pl
from jax.experimental.pallas import tpu as pltpu


def _round_up(n, m):
    return ((n + m - 1) // m) * m


def net_kernel(x_ref, w1_ref, b1_ref, w2_ref, b2_ref, o_ref):
    """All refs are VMEM.
    x_ref:  (input_dim, Bt)   streamed batch tile (batch on lanes)
    w1_ref: (hidden, input_dim)  resident
    b1_ref: (hidden, 1)          resident
    w2_ref: (output, hidden)     resident
    b2_ref: (output, 1)          resident
    o_ref:  (output, Bt)         lane-dense output tile
    """
    hid, in_dim = w1_ref.shape
    out_dim = o_ref.shape[0]

    x = x_ref[...]                                        # (in, Bt)

    # fc1 on the VPU: in_dim rank-1 broadcast-FMAs, exact f32 (no MXU pass).
    #   h = W1 @ x + b1 ;  (hid,1)*(1,Bt) broadcasts -> (hid, Bt)
    h = b1_ref[...] + w1_ref[:, 0:1] * x[0:1, :]
    for k in range(1, in_dim):
        h = h + w1_ref[:, k:k + 1] * x[k:k + 1, :]
    h = jnp.maximum(h, 0.0)

    # fc2 on the VPU, built directly as a stacked (out_dim, Bt) tensor.
    #   z = W2 @ h + b2
    z = b2_ref[...] + w2_ref[:, 0:1] * h[0:1, :]
    for k in range(1, hid):
        z = z + w2_ref[:, k:k + 1] * h[k:k + 1, :]

    # log_softmax over the tiny class axis via explicit pairwise VPU max and
    # EUP exp/log on (1, Bt) slices — no XLU cross-lane reduction.
    m = z[0:1, :]
    for c in range(1, out_dim):
        m = jnp.maximum(m, z[c:c + 1, :])
    se = jnp.exp(z[0:1, :] - m)
    for c in range(1, out_dim):
        se = se + jnp.exp(z[c:c + 1, :] - m)
    lse = m + jnp.log(se)                                 # (1, Bt)

    # Single lane-dense store of the full (out_dim, Bt) block.
    o_ref[...] = z - lse


def prepare_params(w1, b1, w2, b2):
    """One-time parameter re-layout (PyTorch nn.Linear conventions in)."""
    return (
        jnp.asarray(w1, jnp.float32),              # (hidden, input_dim)
        jnp.asarray(b1, jnp.float32)[:, None],     # (hidden, 1)
        jnp.asarray(w2, jnp.float32),              # (output, hidden)
        jnp.asarray(b2, jnp.float32)[:, None],     # (output, 1)
    )


def _choose_batch_tile(B, block_batch):
    """Large lane-dense tiles; >=4 grid steps when B is big (v7x dual-TC)."""
    b_rounded = _round_up(B, 128)
    if block_batch is None:
        bt = _round_up(-(-B // 4), 128)            # aim for ~4 grid steps
        bt = max(8192, min(bt, 32768))             # 0.5–2 MiB of x per step
    else:
        bt = _round_up(block_batch, 128)
    return min(bt, b_rounded)


def net_forward_feature_major(x_t, w1, b1_col, w2, b2_col, *, block_batch=None):
    """x_t: (input_dim, B) f32, feature-major.  Returns (output_dim, B)."""
    in_dim, B = x_t.shape
    hid = w1.shape[0]
    out_dim = w2.shape[0]

    bt = _choose_batch_tile(B, block_batch)
    grid = (pl.cdiv(B, bt),)

    cost = pl.CostEstimate(
        flops=2 * B * (in_dim * hid + hid * out_dim),
        transcendentals=(out_dim + 1) * B,
        bytes_accessed=4 * (B * in_dim + B * out_dim
                            + hid * in_dim + hid + out_dim * hid + out_dim),
    )

    return pl.pallas_call(
        net_kernel,
        out_shape=jax.ShapeDtypeStruct((out_dim, B), jnp.float32),
        grid=grid,
        in_specs=[
            pl.BlockSpec((in_dim, bt), lambda i: (0, i)),    # x tile (streamed)
            pl.BlockSpec((hid, in_dim), lambda i: (0, 0)),   # W1 (resident)
            pl.BlockSpec((hid, 1), lambda i: (0, 0)),        # b1 (resident)
            pl.BlockSpec((out_dim, hid), lambda i: (0, 0)),  # W2 (resident)
            pl.BlockSpec((out_dim, 1), lambda i: (0, 0)),    # b2 (resident)
        ],
        out_specs=pl.BlockSpec((out_dim, bt), lambda i: (0, i)),
        compiler_params=pltpu.CompilerParams(
            dimension_semantics=("parallel",),               # v7x dual-TC shard
        ),
        cost_estimate=cost,
    )(x_t, w1, b1_col, w2, b2_col)


@partial(jax.jit, static_argnames=("block_batch", "min_pallas_batch"))
def net_forward(x, w1, b1_col, w2, b2_col, *, block_batch=None,
                min_pallas_batch=2048):
    """x: (B, input_dim) f32 (PyTorch interface).  Params from prepare_params."""
    B, _ = x.shape
    x = jnp.asarray(x, jnp.float32)

    # Small-B fast path: one XLA fusion beats pallas launch + pipeline overhead
    # and avoids the two wrapper transposes entirely.
    if B <= min_pallas_batch:
        h = jnp.maximum(x @ w1.T + b1_col[:, 0], 0.0)
        z = h @ w2.T + b2_col[:, 0]
        return jax.nn.log_softmax(z, axis=1)

    # Feature-major layout for the kernel; this transpose fuses under jit.
    # Preferred: keep activations feature-major upstream and call
    # net_forward_feature_major directly.
    out_t = net_forward_feature_major(x.T, w1, b1_col, w2, b2_col,
                                      block_batch=block_batch)
    return out_t.T                                           # (B, output_dim)


def init_params(key, input_dim=10, hidden_dim=5, output_dim=2):
    """Deterministic init mimicking PyTorch nn.Linear (uniform +/- 1/sqrt(fan_in))."""
    k1, k2, k3, k4 = jax.random.split(key, 4)
    bound1 = 1.0 / (input_dim ** 0.5)
    bound2 = 1.0 / (hidden_dim ** 0.5)
    w1 = jax.random.uniform(k1, (hidden_dim, input_dim), jnp.float32, -bound1, bound1)
    b1 = jax.random.uniform(k2, (hidden_dim,), jnp.float32, -bound1, bound1)
    w2 = jax.random.uniform(k3, (output_dim, hidden_dim), jnp.float32, -bound2, bound2)
    b2 = jax.random.uniform(k4, (output_dim,), jnp.float32, -bound2, bound2)
    return w1, b1, w2, b2


# TODO(synk): add_dimensions / add_dimensions_cat are host-side parameter-growing
# utilities (not part of forward); they are not translated to Pallas.


if __name__ == "__main__":
    key = jax.random.PRNGKey(0)
    kx, kp = jax.random.split(key)

    batch, input_dim, hidden_dim, output_dim = 256, 10, 5, 2
    x = jax.random.normal(kx, (batch, input_dim), jnp.float32)
    w1, b1, w2, b2 = init_params(kp, input_dim, hidden_dim, output_dim)
    params = prepare_params(w1, b1, w2, b2)

    # Force the Pallas path (min_pallas_batch=0) with a 128-wide tile so the
    # example exercises a 2-step pipelined grid even at this small batch.
    out = net_forward(x, *params, block_batch=128, min_pallas_batch=0)
    out = jax.block_until_ready(out)

    # Pure-JAX reference check (same math, outside Pallas).
    h_ref = jnp.maximum(x @ w1.T + b1, 0.0)
    z_ref = h_ref @ w2.T + b2
    ref = jax.nn.log_softmax(z_ref, axis=1)
    assert out.shape == (batch, output_dim)
    assert jnp.allclose(out, ref, atol=1e-5), "mismatch vs reference"

    # Also sanity-check the small-B XLA fast path (no Pallas launch).
    out_small = jax.block_until_ready(net_forward(x[:32], *params))
    assert jnp.allclose(out_small, ref[:32], atol=1e-5), "fast-path mismatch"

    print("KERNEL_OK")
</pallas_src>

<mosaic_0001>
module attributes {stable_mosaic.version = 11 : i64} {
  func.func @net_kernel(%arg0: i32, %arg1: memref<10x128xf32, #tpu.memory_space<vmem>>, %arg2: memref<5x10xf32, #tpu.memory_space<vmem>>, %arg3: memref<5x1xf32, #tpu.memory_space<vmem>>, %arg4: memref<2x5xf32, #tpu.memory_space<vmem>>, %arg5: memref<2x1xf32, #tpu.memory_space<vmem>>, %arg6: memref<2x128xf32, #tpu.memory_space<vmem>>) attributes {dimension_semantics = [#tpu.dimension_semantics<parallel>], iteration_bounds = array<i64: 2>, scalar_prefetch = 0 : i64, scratch_operands = 0 : i64, tpu.core_type = #tpu.core_type<tc>, window_params = [{transform_indices = @transform_0, window_bounds = array<i64: 10, 128>}, {pipeline_mode = #tpu.pipeline_mode<synchronous>, transform_indices = @transform_1, window_bounds = array<i64: 5, 10>}, {pipeline_mode = #tpu.pipeline_mode<synchronous>, transform_indices = @transform_2, window_bounds = array<i64: 5, 1>}, {pipeline_mode = #tpu.pipeline_mode<synchronous>, transform_indices = @transform_3, window_bounds = array<i64: 2, 5>}, {pipeline_mode = #tpu.pipeline_mode<synchronous>, transform_indices = @transform_4, window_bounds = array<i64: 2, 1>}, {transform_indices = @transform_5, window_bounds = array<i64: 2, 128>}]} {
    %c0 = arith.constant 0 : index
    %c0_0 = arith.constant 0 : index
    %0 = vector.load %arg1[%c0, %c0_0] : memref<10x128xf32, #tpu.memory_space<vmem>>, vector<10x128xf32>
    %c0_1 = arith.constant 0 : index
    %c0_2 = arith.constant 0 : index
    %1 = vector.load %arg3[%c0_1, %c0_2] : memref<5x1xf32, #tpu.memory_space<vmem>>, vector<5x1xf32>
    %c0_3 = arith.constant 0 : index
    %c0_4 = arith.constant 0 : index
    %2 = vector.load %arg2[%c0_3, %c0_4] : memref<5x10xf32, #tpu.memory_space<vmem>>, vector<5x1xf32>
    %3 = vector.extract_strided_slice %0 {offsets = [0, 0], sizes = [1, 128], strides = [1, 1]} : vector<10x128xf32> to vector<1x128xf32>
    %4 = vector.broadcast %2 : vector<5x1xf32> to vector<5x128xf32>
    %5 = vector.broadcast %3 : vector<1x128xf32> to vector<5x128xf32>
    %6 = arith.mulf %4, %5 : vector<5x128xf32>
    %7 = vector.broadcast %1 : vector<5x1xf32> to vector<5x128xf32>
    %8 = arith.addf %7, %6 : vector<5x128xf32>
    %c0_5 = arith.constant 0 : index
    %c1 = arith.constant 1 : index
    %9 = vector.load %arg2[%c0_5, %c1] : memref<5x10xf32, #tpu.memory_space<vmem>>, vector<5x1xf32>
    %10 = vector.extract_strided_slice %0 {offsets = [1, 0], sizes = [1, 128], strides = [1, 1]} : vector<10x128xf32> to vector<1x128xf32>
    %11 = vector.broadcast %9 : vector<5x1xf32> to vector<5x128xf32>
    %12 = vector.broadcast %10 : vector<1x128xf32> to vector<5x128xf32>
    %13 = arith.mulf %11, %12 : vector<5x128xf32>
    %14 = arith.addf %8, %13 : vector<5x128xf32>
    %c0_6 = arith.constant 0 : index
    %c2 = arith.constant 2 : index
    %15 = vector.load %arg2[%c0_6, %c2] : memref<5x10xf32, #tpu.memory_space<vmem>>, vector<5x1xf32>
    %16 = vector.extract_strided_slice %0 {offsets = [2, 0], sizes = [1, 128], strides = [1, 1]} : vector<10x128xf32> to vector<1x128xf32>
    %17 = vector.broadcast %15 : vector<5x1xf32> to vector<5x128xf32>
    %18 = vector.broadcast %16 : vector<1x128xf32> to vector<5x128xf32>
    %19 = arith.mulf %17, %18 : vector<5x128xf32>
    %20 = arith.addf %14, %19 : vector<5x128xf32>
    %c0_7 = arith.constant 0 : index
    %c3 = arith.constant 3 : index
    %21 = vector.load %arg2[%c0_7, %c3] : memref<5x10xf32, #tpu.memory_space<vmem>>, vector<5x1xf32>
    %22 = vector.extract_strided_slice %0 {offsets = [3, 0], sizes = [1, 128], strides = [1, 1]} : vector<10x128xf32> to vector<1x128xf32>
    %23 = vector.broadcast %21 : vector<5x1xf32> to vector<5x128xf32>
    %24 = vector.broadcast %22 : vector<1x128xf32> to vector<5x128xf32>
    %25 = arith.mulf %23, %24 : vector<5x128xf32>
    %26 = arith.addf %20, %25 : vector<5x128xf32>
    %c0_8 = arith.constant 0 : index
    %c4 = arith.constant 4 : index
    %27 = vector.load %arg2[%c0_8, %c4] : memref<5x10xf32, #tpu.memory_space<vmem>>, vector<5x1xf32>
    %28 = vector.extract_strided_slice %0 {offsets = [4, 0], sizes = [1, 128], strides = [1, 1]} : vector<10x128xf32> to vector<1x128xf32>
    %29 = vector.broadcast %27 : vector<5x1xf32> to vector<5x128xf32>
    %30 = vector.broadcast %28 : vector<1x128xf32> to vector<5x128xf32>
    %31 = arith.mulf %29, %30 : vector<5x128xf32>
    %32 = arith.addf %26, %31 : vector<5x128xf32>
    %c0_9 = arith.constant 0 : index
    %c5 = arith.constant 5 : index
    %33 = vector.load %arg2[%c0_9, %c5] : memref<5x10xf32, #tpu.memory_space<vmem>>, vector<5x1xf32>
    %34 = vector.extract_strided_slice %0 {offsets = [5, 0], sizes = [1, 128], strides = [1, 1]} : vector<10x128xf32> to vector<1x128xf32>
    %35 = vector.broadcast %33 : vector<5x1xf32> to vector<5x128xf32>
    %36 = vector.broadcast %34 : vector<1x128xf32> to vector<5x128xf32>
    %37 = arith.mulf %35, %36 : vector<5x128xf32>
    %38 = arith.addf %32, %37 : vector<5x128xf32>
    %c0_10 = arith.constant 0 : index
    %c6 = arith.constant 6 : index
    %39 = vector.load %arg2[%c0_10, %c6] : memref<5x10xf32, #tpu.memory_space<vmem>>, vector<5x1xf32>
    %40 = vector.extract_strided_slice %0 {offsets = [6, 0], sizes = [1, 128], strides = [1, 1]} : vector<10x128xf32> to vector<1x128xf32>
    %41 = vector.broadcast %39 : vector<5x1xf32> to vector<5x128xf32>
    %42 = vector.broadcast %40 : vector<1x128xf32> to vector<5x128xf32>
    %43 = arith.mulf %41, %42 : vector<5x128xf32>
    %44 = arith.addf %38, %43 : vector<5x128xf32>
    %c0_11 = arith.constant 0 : index
    %c7 = arith.constant 7 : index
    %45 = vector.load %arg2[%c0_11, %c7] : memref<5x10xf32, #tpu.memory_space<vmem>>, vector<5x1xf32>
    %46 = vector.extract_strided_slice %0 {offsets = [7, 0], sizes = [1, 128], strides = [1, 1]} : vector<10x128xf32> to vector<1x128xf32>
    %47 = vector.broadcast %45 : vector<5x1xf32> to vector<5x128xf32>
    %48 = vector.broadcast %46 : vector<1x128xf32> to vector<5x128xf32>
    %49 = arith.mulf %47, %48 : vector<5x128xf32>
    %50 = arith.addf %44, %49 : vector<5x128xf32>
    %c0_12 = arith.constant 0 : index
    %c8 = arith.constant 8 : index
    %51 = vector.load %arg2[%c0_12, %c8] : memref<5x10xf32, #tpu.memory_space<vmem>>, vector<5x1xf32>
    %52 = vector.extract_strided_slice %0 {offsets = [8, 0], sizes = [1, 128], strides = [1, 1]} : vector<10x128xf32> to vector<1x128xf32>
    %53 = vector.broadcast %51 : vector<5x1xf32> to vector<5x128xf32>
    %54 = vector.broadcast %52 : vector<1x128xf32> to vector<5x128xf32>
    %55 = arith.mulf %53, %54 : vector<5x128xf32>
    %56 = arith.addf %50, %55 : vector<5x128xf32>
    %c0_13 = arith.constant 0 : index
    %c9 = arith.constant 9 : index
    %57 = vector.load %arg2[%c0_13, %c9] : memref<5x10xf32, #tpu.memory_space<vmem>>, vector<5x1xf32>
    %58 = vector.extract_strided_slice %0 {offsets = [9, 0], sizes = [1, 128], strides = [1, 1]} : vector<10x128xf32> to vector<1x128xf32>
    %59 = vector.broadcast %57 : vector<5x1xf32> to vector<5x128xf32>
    %60 = vector.broadcast %58 : vector<1x128xf32> to vector<5x128xf32>
    %61 = arith.mulf %59, %60 : vector<5x128xf32>
    %62 = arith.addf %56, %61 : vector<5x128xf32>
    %cst = arith.constant 0.000000e+00 : f32
    %63 = vector.broadcast %cst : f32 to vector<5x128xf32>
    %64 = arith.maximumf %62, %63 : vector<5x128xf32>
    %c0_14 = arith.constant 0 : index
    %c0_15 = arith.constant 0 : index
    %65 = vector.load %arg5[%c0_14, %c0_15] : memref<2x1xf32, #tpu.memory_space<vmem>>, vector<2x1xf32>
    %c0_16 = arith.constant 0 : index
    %c0_17 = arith.constant 0 : index
    %66 = vector.load %arg4[%c0_16, %c0_17] : memref<2x5xf32, #tpu.memory_space<vmem>>, vector<2x1xf32>
    %67 = vector.extract_strided_slice %64 {offsets = [0, 0], sizes = [1, 128], strides = [1, 1]} : vector<5x128xf32> to vector<1x128xf32>
    %68 = vector.broadcast %66 : vector<2x1xf32> to vector<2x128xf32>
    %69 = vector.broadcast %67 : vector<1x128xf32> to vector<2x128xf32>
    %70 = arith.mulf %68, %69 : vector<2x128xf32>
    %71 = vector.broadcast %65 : vector<2x1xf32> to vector<2x128xf32>
    %72 = arith.addf %71, %70 : vector<2x128xf32>
    %c0_18 = arith.constant 0 : index
    %c1_19 = arith.constant 1 : index
    %73 = vector.load %arg4[%c0_18, %c1_19] : memref<2x5xf32, #tpu.memory_space<vmem>>, vector<2x1xf32>
    %74 = vector.extract_strided_slice %64 {offsets = [1, 0], sizes = [1, 128], strides = [1, 1]} : vector<5x128xf32> to vector<1x128xf32>
    %75 = vector.broadcast %73 : vector<2x1xf32> to vector<2x128xf32>
    %76 = vector.broadcast %74 : vector<1x128xf32> to vector<2x128xf32>
    %77 = arith.mulf %75, %76 : vector<2x128xf32>
    %78 = arith.addf %72, %77 : vector<2x128xf32>
    %c0_20 = arith.constant 0 : index
    %c2_21 = arith.constant 2 : index
    %79 = vector.load %arg4[%c0_20, %c2_21] : memref<2x5xf32, #tpu.memory_space<vmem>>, vector<2x1xf32>
    %80 = vector.extract_strided_slice %64 {offsets = [2, 0], sizes = [1, 128], strides = [1, 1]} : vector<5x128xf32> to vector<1x128xf32>
    %81 = vector.broadcast %79 : vector<2x1xf32> to vector<2x128xf32>
    %82 = vector.broadcast %80 : vector<1x128xf32> to vector<2x128xf32>
    %83 = arith.mulf %81, %82 : vector<2x128xf32>
    %84 = arith.addf %78, %83 : vector<2x128xf32>
    %c0_22 = arith.constant 0 : index
    %c3_23 = arith.constant 3 : index
    %85 = vector.load %arg4[%c0_22, %c3_23] : memref<2x5xf32, #tpu.memory_space<vmem>>, vector<2x1xf32>
    %86 = vector.extract_strided_slice %64 {offsets = [3, 0], sizes = [1, 128], strides = [1, 1]} : vector<5x128xf32> to vector<1x128xf32>
    %87 = vector.broadcast %85 : vector<2x1xf32> to vector<2x128xf32>
    %88 = vector.broadcast %86 : vector<1x128xf32> to vector<2x128xf32>
    %89 = arith.mulf %87, %88 : vector<2x128xf32>
    %90 = arith.addf %84, %89 : vector<2x128xf32>
    %c0_24 = arith.constant 0 : index
    %c4_25 = arith.constant 4 : index
    %91 = vector.load %arg4[%c0_24, %c4_25] : memref<2x5xf32, #tpu.memory_space<vmem>>, vector<2x1xf32>
    %92 = vector.extract_strided_slice %64 {offsets = [4, 0], sizes = [1, 128], strides = [1, 1]} : vector<5x128xf32> to vector<1x128xf32>
    %93 = vector.broadcast %91 : vector<2x1xf32> to vector<2x128xf32>
    %94 = vector.broadcast %92 : vector<1x128xf32> to vector<2x128xf32>
    %95 = arith.mulf %93, %94 : vector<2x128xf32>
    %96 = arith.addf %90, %95 : vector<2x128xf32>
    %97 = vector.extract_strided_slice %96 {offsets = [0, 0], sizes = [1, 128], strides = [1, 1]} : vector<2x128xf32> to vector<1x128xf32>
    %98 = vector.extract_strided_slice %96 {offsets = [1, 0], sizes = [1, 128], strides = [1, 1]} : vector<2x128xf32> to vector<1x128xf32>
    %99 = arith.maximumf %97, %98 : vector<1x128xf32>
    %100 = vector.extract_strided_slice %96 {offsets = [0, 0], sizes = [1, 128], strides = [1, 1]} : vector<2x128xf32> to vector<1x128xf32>
    %101 = arith.subf %100, %99 : vector<1x128xf32>
    %102 = math.exp %101 : vector<1x128xf32>
    %103 = vector.extract_strided_slice %96 {offsets = [1, 0], sizes = [1, 128], strides = [1, 1]} : vector<2x128xf32> to vector<1x128xf32>
    %104 = arith.subf %103, %99 : vector<1x128xf32>
    %105 = math.exp %104 : vector<1x128xf32>
    %106 = arith.addf %102, %105 : vector<1x128xf32>
    %107 = math.log %106 : vector<1x128xf32>
    %108 = arith.addf %99, %107 : vector<1x128xf32>
    %109 = vector.broadcast %108 : vector<1x128xf32> to vector<2x128xf32>
    %110 = arith.subf %96, %109 : vector<2x128xf32>
    %c0_26 = arith.constant 0 : index
    %c0_27 = arith.constant 0 : index
    %111 = vector.load %arg6[%c0_26, %c0_27] : memref<2x128xf32, #tpu.memory_space<vmem>>, vector<2x128xf32>
    tpu.vector_store %arg6[%c0_26, %c0_27], %110 {strides = array<i32>} : memref<2x128xf32, #tpu.memory_space<vmem>>, vector<2x128xf32>,
    return
  }
  func.func @transform_0(%arg0: i32) -> (i32, i32) {
    %c0_i32 = arith.constant 0 : i32
    %c0_i32_0 = arith.constant 0 : i32
    return %c0_i32, %arg0 : i32, i32
  }
  func.func @transform_1(%arg0: i32) -> (i32, i32) {
    %c0_i32 = arith.constant 0 : i32
    %c0_i32_0 = arith.constant 0 : i32
    %c0_i32_1 = arith.constant 0 : i32
    return %c0_i32, %c0_i32_0 : i32, i32
  }
  func.func @transform_2(%arg0: i32) -> (i32, i32) {
    %c0_i32 = arith.constant 0 : i32
    %c0_i32_0 = arith.constant 0 : i32
    %c0_i32_1 = arith.constant 0 : i32
    return %c0_i32, %c0_i32_0 : i32, i32
  }
  func.func @transform_3(%arg0: i32) -> (i32, i32) {
    %c0_i32 = arith.constant 0 : i32
    %c0_i32_0 = arith.constant 0 : i32
    %c0_i32_1 = arith.constant 0 : i32
    return %c0_i32, %c0_i32_0 : i32, i32
  }
  func.func @transform_4(%arg0: i32) -> (i32, i32) {
    %c0_i32 = arith.constant 0 : i32
    %c0_i32_0 = arith.constant 0 : i32
    %c0_i32_1 = arith.constant 0 : i32
    return %c0_i32, %c0_i32_0 : i32, i32
  }
  func.func @transform_5(%arg0: i32) -> (i32, i32) {
    %c0_i32 = arith.constant 0 : i32
    %c0_i32_0 = arith.constant 0 : i32
    return %c0_i32, %arg0 : i32, i32
  }
}

</mosaic_0001>

<bundles_post_ra>
// kernel: net_forward.1
= control target key start
LH: loop header
LB: loop body
LE: loop exit
PB: predicated region body
PF: predicated region fallthrough
CT: control target
= control target key end

     0   :  { %10 = vsyncpa [#allocation3], 0  ;;  %s853_s0 = inlined_call_operand.hbm [shape: f32[10,256], index: 0, kind: input, shape index: {}]   ;;  %s854_s1 = inlined_call_operand.vmem [shape: f32[5,10], index: 1, kind: input, shape index: {}]   ;;  %s855_s2 = inlined_call_operand.vmem [shape: f32[5,1], index: 2, kind: input, shape index: {}]   ;;  %s856_s3 = inlined_call_operand.vmem [shape: f32[2,5], index: 3, kind: input, shape index: {}]   ;;  %s857_s4 = inlined_call_operand.vmem [shape: f32[2,1], index: 4, kind: input, shape index: {}]   ;;  %s858_s5 = inlined_call_operand.hbm [shape: f32[2,256], index: 5, kind: output, shape index: {}]  }
   0x1   :  { %12 = vsyncpa [#allocation3 + $0x1], 0 }
   0x2   :  { %13 = vsyncpa [#allocation4], 0 }
   0x3   :  { %15 = vsyncpa [#allocation4 + $0x1], 0  ;;  %s711_s18 = smov 0   ;;  %s713_s19 = smov 0  }
   0x4   :  { %s715_s20 = smov 0   ;;  %s717_s21 = smov 0  }
   0x5 LB: > { %s732_s22 = sadd.s32 4294967295, %s666_s21   ;;  %s477_s23 = sadd.s32 4294967294, %s666_s21   ;;  %s666_s21 = sphi %s717_s21, %s867_s21   ;;  %s662_s20 = sphi %s715_s20, %s866_s20   ;;  %s658_s19 = sphi %s713_s19, %s865_s19   ;;  %s654_s18 = sphi %s711_s18, %s864_s18  }
   0x6   : > { %s736_s24 = sadd.s32 1, %s666_s21   ;;  %s28_s25 = sadd.s32 1, %s662_s20 }
   0x7   : > { %s25_s26 = ssub.s32 %s666_s21, %s736_s24  ;;  %p35_p0 = scmp.ne.s32.totalorder %s662_s20, %s658_s19 }
   0x8   : > { %p26_p1 = scmp.eq.s32.totalorder %s25_s26, 0  ;;  %p36_p2 = scmp.eq.s32.totalorder %s666_s21, 0 }
   0x9   : > { %p41_p3 = scmp.ne.s32.totalorder %s658_s19, %s654_s18  ;;  %p42_p4 = scmp.eq.s32.totalorder %s732_s22, 0 }
   0xa   : > { %s748_s27 = scalar_select %p26_p1, %s662_s20, %s28_s25  }
   0xb   : > { %p750_p5 = por %p36_p2, %p35_p0  ;;  %p754_p6 = por %p42_p4, %p41_p3 }
   0xc   : > { %p149_p7 = scmp.eq.s32.totalorder %s732_s22, 1  ;;  %p155_p8 = scmp.eq.s32.totalorder %s477_s23, 1 }
   0xd   : > { %p479_p9 = scmp.ge.s32.totalorder %s666_s21, 2  ;;  %p501_p10 = scmp.lt.s32.totalorder %s666_s21, 2 }
   0xe   : > { %p761_p11 = por %p149_p7, %p35_p0  ;;  %p765_p12 = por %p155_p8, %p41_p3 }
   0xf   : > { %s187_s7 = sand.u32 1, %s662_s20   ;;  %s481_s8 = sshll.u32 %s666_s21, 3 }
  0x10   : > { %s480_s9 = sshll.u32 %s187_s7, 4  ;;  %s195_s12 = scalar_lea.hbm %s853_s0, %s481_s8 }
  0x11   : > { %s196_s13 = sshll.u32 %s195_s12, 4  ;;  %s191_s14 = scalar_lea.vmem [#allocation2], %s480_s9  ;;  %s197_s13 = int_to_ptr.hbm [resolvable:$true] %s196_s13 }
  0x12   : > { %s198_s15 = sshll.u32 %s191_s14, 4  ;;  %p776_p13 = pnand %p501_p10, %p750_p5  ;;  %s199_s15 = int_to_ptr.vmem [resolvable:$true] %s198_s15 }
  0x13   : > { %p482_p0 = scmp.ge.s32.totalorder %s666_s21, 1  ;;  %s188_s17 = scalar_lea.sflag [#allocation3], %s187_s7 }
  0x14   : > { %s570_s23 = sshra.s32 %s197_s13, 4  ;;  %p574_p2 = pneg %p776_p13  ;;  %s571_s23 = int_to_ptr.hbm [resolvable:$true] %s570_s23 }
  0x15   : > { %s572_s25 = scalar_lea.hbm %s571_s23, 16  ;;  %s577_s9 = scalar_lea.hbm %s853_s0, 32 }
  0x16   : > { %p573_p1 = scmp.ne.s32.totalorder %s571_s23, %s572_s25  ;;  %p578_p5 = scmp.lt.s32.totalorder %s571_s23, %s853_s0 }
  0x17   : > { %p579_p7 = scmp.lt.s32.totalorder %s577_s9, %s572_s25 }
  0x18   : > { %p575_p3 = pnand %p574_p2, %p573_p1 }
  0x19   : > { %p580_p8 = por %p579_p7, %p578_p5 }
  0x1a   : > { %p576_p4 = pneg %p575_p3 }
  0x1c   : > { %p581_p10 = pnand %p580_p8, %p576_p4 }
  0x1e   : > { %584 = shalt.err (!%p581_p10)
}
  0x1f   : > { %s668_s7 = smov 256   ;;  %s669_s11 = smov 128  }
  0x20   : > { %s670_s12 = smov 8   ;;  %p206_p1 = scmp.lt.s32.totalorder %s666_s21, 3 }
  0x21   : > { %496 = dma.hbm_to_vmem [thread:$0]  (!%p776_p13), %s197_s13, 256, %s199_s15, %s188_s17, %s668_s7, %s669_s11, %s670_s12  }
  0x22   : > { %p207_p2 = pnand %p482_p0, %p206_p1 }
  0x23   : > { %s795_s14 = sand.u32 (!%p207_p2), 1, %s658_s19  }
  0x24   : > { %210 = sbr.rel (%p207_p2) target bundleno = 251 (0xfb), region = 40  ;;  %s483_s23 = sshll.u32 (!%p207_p2), %s795_s14, 4 }
  0x25   : > { %s213_s25 = scalar_lea.sflag (!%p207_p2), [#allocation3], %s795_s14  ;;  %s799_s26 = scalar_lea.vmem (!%p207_p2), [#allocation2], %s483_s23 }
  0x29   : > { %645 = dma.done.wait (%p754_p6), %s213_s25, 256  }
  0x2a   : > { %647 = vsyncadd (%p754_p6), %s213_s25, 4294967040  ;;  %v671_v0 = vmov 1   ;;  %v672_v1 = vmov 0   ;;  %v673_v2 = vmov 3   ;;  %v247_v3 = vld [vmem:[%s854_s1] sm:$0x1f] }
  0x2b   : > { %549 = vset.pattern.permute.xlu1 %v671_v0  ;;  %548 = vset.pattern.permute.xlu0 %v672_v1  ;;  %v246_v4 = vld [vmem:[%s855_s2] sm:$0x1f]  ;;  %v674_v5 = vmov 2   ;;  %v675_v6 = vmov 4   ;;  %v676_v7 = vmov 5   ;;  %v677_v8 = vmov 6  }
  0x2c   : > { %551 = vset.pattern.permute.xlu2 %v673_v2  ;;  %262 = vperm.xlu1 %549, %v247_v3   ;;  %v678_v9 = vmov 7   ;;  %v326_v10 = vld [vmem:[%s856_s3] sm:$0x3]  ;;  %v679_v11 = vmov 8   ;;  %v680_v12 = vmov 9   ;;  %s484_s10 = sshll.u32 %s795_s14, 1 }
  0x2d   : > { %250 = vperm.xlu0 %548, %v247_v3   ;;  %276 = vperm.xlu2 %551, %v247_v3   ;;  %v325_v13 = vld [vmem:[%s857_s4] sm:$0x3]  ;;  %v245_v45 = vld [vmem:[%s799_s26 + $0x8] sm:$0x3]  ;;  %s486_s7 = sshll.u32 %s732_s22, 1  ;;  %s243_s25 = scalar_lea.vmem [#allocation5], %s484_s10 }
  0x2e   : > { %v244_v15 = vld [vmem:[%s799_s26] sm:$0xff]  ;;  %v321_v48 = vperm.slane %v245_v45, 1  ;;  %v314_v49 = vperm.slane %v245_v45, 0  ;;  %s402_s23 = scalar_lea.hbm %s858_s5, %s486_s7  ;;  %s404_s26 = sshll.u32 %s243_s25, 4  ;;  %s405_s26 = int_to_ptr.vmem [resolvable:$true] %s404_s26 }
  0x2f   : > { %v253_v18 = vperm.slane %v244_v15, 0  ;;  %v265_v19 = vperm.slane %v244_v15, 1  ;;  %v272_v22 = vperm.slane %v244_v15, 2  ;;  %v279_v24 = vperm.slane %v244_v15, 3  ;;  %s406_s13 = sshll.u32 %s402_s23, 4  ;;  %s392_s15 = scalar_lea.sflag [#allocation4], %s795_s14  ;;  %s407_s13 = int_to_ptr.hbm [resolvable:$true] %s406_s13 }
  0x30   : > { %v286_v29 = vperm.slane %v244_v15, 4  ;;  %v293_v33 = vperm.slane %v244_v15, 5  ;;  %v300_v37 = vperm.slane %v244_v15, 6  ;;  %v307_v42 = vperm.slane %v244_v15, 7  ;;  %s614_s16 = sshra.s32 %s407_s13, 4  ;;  %s620_s8 = scalar_lea.hbm %s858_s5, 4  ;;  %s615_s16 = int_to_ptr.hbm [resolvable:$true] %s614_s16 }
  0x31   : > { %s616_s22 = scalar_lea.hbm %s615_s16, 2  ;;  %p621_p3 = scmp.lt.s32.totalorder %s615_s16, %s858_s5 }
  0x32   : > { %p617_p6 = scmp.ne.s32.totalorder %s615_s16, %s616_s22  ;;  %p622_p4 = scmp.lt.s32.totalorder %s620_s8, %s616_s22 }
  0x34   : > { %550 = vset.pattern.permute.xlu1 %v674_v5  ;;  %p618_p13 = pnand %p617_p6, %p761_p11  ;;  %p623_p5 = por %p622_p4, %p621_p3 }
  0x35   : > { %257 = vperm.xlu0 %548, %v246_v4   ;;  %269 = vperm.xlu1 %550, %v247_v3  }
  0x36   : > { %552 = vset.pattern.permute.xlu2 %v675_v6  ;;  %p619_p0 = pneg %p618_p13 }
  0x37   : > { %283 = vperm.xlu2 %552, %v247_v3  }
  0x38   : > { %p624_p7 = pnand %p623_p5, %p619_p0 }
  0x3d   : > { %553 = vset.pattern.permute.xlu0 %v676_v7  ;;  %554 = vset.pattern.permute.xlu1 %v677_v8 }
  0x3e   : > { %290 = vperm.xlu0 %553, %v247_v3   ;;  %297 = vperm.xlu1 %554, %v247_v3  }
  0x3f   : > { %555 = vset.pattern.permute.xlu2 %v678_v9 }
  0x40   : > { %304 = vperm.xlu2 %555, %v247_v3  }
  0x46   : > { %558 = vset.pattern.permute.xlu0 %v672_v1  ;;  %556 = vset.pattern.permute.xlu1 %v679_v11 }
  0x47   : > { %329 = vperm.xlu0 %558, %v326_v10   ;;  %311 = vperm.xlu1 %556, %v247_v3  }
  0x48   : > { %557 = vset.pattern.permute.xlu2 %v680_v12 }
  0x49   : > { %318 = vperm.xlu2 %557, %v247_v3  }
  0x4f   : > { %563 = vset.pattern.permute.xlu0 %v675_v6  ;;  %559 = vset.pattern.permute.xlu1 %v672_v1 }
  0x50   : > { %362 = vperm.xlu0 %563, %v326_v10   ;;  %336 = vperm.xlu1 %559, %v325_v13  }
  0x51   : > { %560 = vset.pattern.permute.xlu2 %v671_v0 }
  0x52   : > { %341 = vperm.xlu2 %560, %v326_v10  }
  0x58   : > { %561 = vset.pattern.permute.xlu1 %v674_v5 }
  0x59   : > { %348 = vperm.xlu1 %561, %v326_v10  }
  0x5a   : > { %562 = vset.pattern.permute.xlu2 %v673_v2 }
  0x5b   : > { %355 = vperm.xlu2 %562, %v326_v10  }
  0x87   : > { %v277_v14 = vpop.permute.xlu2 %276 }
  0x88   : > { %v280_v31 = vmul.f32 %v279_v24, %v277_v14 }
  0x91   : > { %v284_v21 = vpop.permute.xlu2 %283 }
  0x92   : > { %v287_v34 = vmul.f32 %v286_v29, %v284_v21 }
  0x9a   : > { %v305_v36 = vpop.permute.xlu2 %304 }
  0x9b   : > { %v308_v46 = vmul.f32 %v307_v42, %v305_v36 }
  0x9e   : > { %v263_v16 = vpop.permute.xlu1 %262 }
  0x9f   : > { %v251_v17 = vpop.permute.xlu0 %250  ;;  %v266_v25 = vmul.f32 %v265_v19, %v263_v16 }
  0xa0   : > { %v254_v20 = vmul.f32 %v253_v18, %v251_v17 }
  0xa3   : > { %v319_v50 = vpop.permute.xlu2 %318 }
  0xa4   : > { %v322_v52 = vmul.f32 %v321_v48, %v319_v50 }
  0xa7   : > { %v258_v23 = vpop.permute.xlu0 %257  ;;  %v270_v27 = vpop.permute.xlu1 %269 }
  0xa8   : > { %v260_v26 = vadd.f32 %v258_v23, %v254_v20  ;;  %v273_v28 = vmul.f32 %v272_v22, %v270_v27 }
  0xaa   : > { %v267_v30 = vadd.f32 %v266_v25, %v260_v26 }
  0xac   : > { %v274_v32 = vadd.f32 %v273_v28, %v267_v30  ;;  %v342_v58 = vpop.permute.xlu2 %341 }
  0xae   : > { %v281_v35 = vadd.f32 %v280_v31, %v274_v32 }
  0xb0   : > { %v291_v38 = vpop.permute.xlu0 %290  ;;  %v288_v39 = vadd.f32 %v287_v34, %v281_v35  ;;  %v298_v41 = vpop.permute.xlu1 %297 }
  0xb1   : > { %v294_v40 = vmul.f32 %v293_v33, %v291_v38  ;;  %v301_v44 = vmul.f32 %v300_v37, %v298_v41 }
  0xb3   : > { %v295_v43 = vadd.f32 %v294_v40, %v288_v39 }
  0xb5   : > { %v302_v47 = vadd.f32 %v301_v44, %v295_v43  ;;  %v356_v4 = vpop.permute.xlu2 %355 }
  0xb7   : > { %v309_v53 = vadd.f32 %v308_v46, %v302_v47 }
  0xb9   : > { %v312_v51 = vpop.permute.xlu1 %311  ;;  %v330_v61 = vpop.permute.xlu0 %329 }
  0xba   : > { %v315_v54 = vmul.f32 %v314_v49, %v312_v51 }
  0xbc   : > { %v316_v55 = vadd.f32 %v315_v54, %v309_v53 }
  0xbe   : > { %v323_v56 = vadd.f32 %v322_v52, %v316_v55 }
  0xc0   : > { %v324_v57 = vmax.f32 %v323_v56, 0.0 }
  0xc2   : > { %v332_v59 = vperm.slane %v324_v57, 0  ;;  %v337_v60 = vpop.permute.xlu1 %336  ;;  %v344_v63 = vperm.slane %v324_v57, 1  ;;  %v358_v2 = vperm.slane %v324_v57, 3  ;;  %v351_v3 = vperm.slane %v324_v57, 2  ;;  %v363_v9 = vpop.permute.xlu0 %362 }
  0xc3   : > { %v365_v7 = vperm.slane %v324_v57, 4 }
  0xc4   : > { %v333_v62 = vmul.f32 %v332_v59, %v330_v61  ;;  %v345_v1 = vmul.f32 %v344_v63, %v342_v58  ;;  %v359_v10 = vmul.f32 %v358_v2, %v356_v4 }
  0xc5   : > { %v366_v12 = vmul.f32 %v365_v7, %v363_v9 }
  0xc6   : > { %v339_v0 = vadd.f32 %v337_v60, %v333_v62 }
  0xc8   : > { %v346_v6 = vadd.f32 %v345_v1, %v339_v0 }
  0xcb   : > { %v349_v5 = vpop.permute.xlu1 %348 }
  0xcc   : > { %v352_v8 = vmul.f32 %v351_v3, %v349_v5 }
  0xce   : > { %v353_v11 = vadd.f32 %v352_v8, %v346_v6 }
  0xd0   : > { %v360_v13 = vadd.f32 %v359_v10, %v353_v11 }
  0xd2   : > { %v367_v14 = vadd.f32 %v366_v12, %v360_v13 }
  0xd4   : > { %v369_v15 = vrot.slane %v367_v14, 1 }
  0xd6   : > { %v371_v16 = vmax.f32 %v367_v14, %v369_v15 }
  0xd8   : > { %v372_v17 = vsub.f32 %v367_v14, %v371_v16  ;;  %v376_v18 = vrot.slane %v371_v16, 7 }
  0xda   : > { %v378_v19 = vsub.f32 %v367_v14, %v376_v18  ;;  %v373_v20 = vmul.f32 1.442695, %v372_v17 }
  0xdc   : > { %v379_v21 = vmul.f32 1.442695, %v378_v19 }
  0xde   : > { %564 = vpow2.f32 %v379_v21 }
  0xdf   : > { %566 = vpow2.f32 %v373_v20 }
  0xe4   : > { %v565_v22 = vpop.eup %564 }
  0xe5   : > { %v382_v23 = vrot.slane %v565_v22, 1  ;;  %v567_v24 = vpop.eup %566 }
  0xe7   : > { %v384_v25 = vadd.f32 %v567_v24, %v382_v23 }
  0xe9   : > { %568 = vlog2.f32 %v384_v25 }
  0xef   : > { %v569_v26 = vpop.eup %568 }
  0xf0   : > { %v386_v27 = vmul.f32 0.6931472, %v569_v26 }
  0xf2   : > { %v387_v28 = vadd.f32 %v386_v27, %v371_v16 }
  0xf4   : > { %v388_v29 = vperm.slane %v387_v28, 0 }
  0xf6   : > { %v389_v30 = vsub.f32 %v367_v14, %v388_v29 }
  0xf8   : > { %390 = vst [vmem:[%s243_s25] sm:$0x3] %v389_v30 }
  0xf9   : > { %627 = shalt.err (!%p624_p7)
}
  0xfa   : > { %491 = dma.vmem_to_hbm [thread:$0]  (%p761_p11), %s405_s26, 32, %s407_s13, %s392_s15  }
  0xfb PF: > { %s418_s14 = sand.u32 1, %s654_s18   ;;  %p498_p8 = pnand %p479_p9, %p765_p12 }
  0xfc   : > { %s419_s10 = scalar_lea.sflag [#allocation4], %s418_s14 }
  0xfd   : > { %p499_p10 = pneg %p498_p8 }
  0xff   : > { %649 = dma.done.wait (%p499_p10), %s419_s10, 32  }
 0x100   : > { %651 = vsyncadd (%p499_p10), %s419_s10, 4294967264  ;;  %p18_p1 = scmp.ge.s32.totalorder %s736_s24, 4   ;;  %s864_s18 = smov %s658_s19 }
 0x101   : > { %s865_s19 = smov %s662_s20  ;;  %s866_s20 = smov %s748_s27 }
 0x102   : > { %s867_s21 = smov %s736_s24  ;;  %20 = sbr.rel (!%p18_p1) target bundleno = 5 (0x5), region = 85 }
 0x107   :  { %425 = vsyncpa [#allocation3], 1 }
 0x108   :  { %427 = vsyncpa [#allocation3 + $0x1], 1 }
 0x109   :  { %428 = vsyncpa [#allocation4], 1 }
 0x10a   :  { %430 = vsyncpa [#allocation4 + $0x1], 1 }

</bundles_post_ra>
